<compile_context>
chip_gen: v7x
topology: tpu7x:2x2x1
jax: 0.10.0
libtpu: 0.0.40
codegen_flags: <defaults>
</compile_context>

<pallas_src>
import functools

import jax
import jax.numpy as jnp
from jax.experimental import pallas as pl
from jax.experimental.pallas import tpu as pltpu

_LANE = 128
_MAX_BLOCK_ROWS = 4096               # 4096 x 128 f32 = 2 MiB per input block
_VMEM_LIMIT_BYTES = 48 * 1024 * 1024  # headroom for big blocks on all gens


def _pow_weight(w, gamma):
    """(1 - pt) ** gamma, with a VPU multiply chain for small integer gamma."""
    g = float(gamma)
    if g == 0.0:
        return jnp.ones_like(w)
    if g.is_integer() and 1.0 <= g <= 8.0:
        r = w
        for _ in range(int(g) - 1):
            r = r * w
        return r
    return w ** g  # non-integer gamma: EUP log/exp pow fallback


def _focal_elementwise(x, t, *, alpha, gamma, logits, binary_targets):
    """Per-element focal loss computed in f32."""
    if logits:
        # stable BCE-with-logits (matches F.binary_cross_entropy_with_logits)
        bce = jnp.maximum(x, 0.0) - x * t + jnp.log1p(jnp.exp(-jnp.abs(x)))
        pt = jnp.exp(-bce)
    elif binary_targets:
        # hard {0,1} targets: one transcendental per element (matches torch BCE
        # with clamped logs exactly for hard targets).
        pt = jnp.where(t > 0.5, x, 1.0 - x)
        bce = -jnp.maximum(jnp.log(pt), -100.0)
    else:
        # matches F.binary_cross_entropy: log terms clamped at -100
        logp = jnp.maximum(jnp.log(x), -100.0)
        log1mp = jnp.maximum(jnp.log(1.0 - x), -100.0)
        bce = -(t * logp + (1.0 - t) * log1mp)
        pt = jnp.exp(-bce)
    return alpha * _pow_weight(1.0 - pt, gamma) * bce


def _focal_sum_kernel(x_ref, t_ref, o_ref, *, alpha, gamma, logits,
                      binary_targets, full_rows, lane_rem, full_blocks,
                      block_rows, blocks_per_slice):
    s = pl.program_id(0)   # megacore slice (parallel)
    i = pl.program_id(1)   # block within slice (arbitrary / reduction)

    @pl.when(i == 0)
    def _():
        o_ref[...] = jnp.zeros_like(o_ref)

    x = x_ref[...].astype(jnp.float32)
    t = t_ref[...].astype(jnp.float32)
    fl = _focal_elementwise(x, t, alpha=alpha, gamma=gamma, logits=logits,
                            binary_targets=binary_targets)

    logical_block = s * blocks_per_slice + i

    # Interior blocks (all elements valid, no Pallas/tail padding): unmasked.
    @pl.when(logical_block < full_blocks)
    def _():
        o_ref[...] += jnp.sum(fl, axis=0, keepdims=True)[None]

    # Boundary block, tail-pad rows and clamped-duplicate blocks: mask first.
    # Row/lane test (no flat int32 index -> no overflow for huge inputs).
    @pl.when(logical_block >= full_blocks)
    def _():
        rid = jax.lax.broadcasted_iota(jnp.int32, fl.shape, 0)
        cid = jax.lax.broadcasted_iota(jnp.int32, fl.shape, 1)
        row = logical_block * block_rows + rid
        valid = (row < full_rows) | ((row == full_rows) & (cid < lane_rem))
        flm = jnp.where(valid, fl, 0.0)     # mask BEFORE the reduction
        o_ref[...] += jnp.sum(flm, axis=0, keepdims=True)[None]


def _focal_elem_kernel(x_ref, t_ref, o_ref, *, alpha, gamma, logits,
                       binary_targets):
    x = x_ref[...].astype(jnp.float32)
    t = t_ref[...].astype(jnp.float32)
    fl = _focal_elementwise(x, t, alpha=alpha, gamma=gamma, logits=logits,
                            binary_targets=binary_targets)
    o_ref[...] = fl.astype(o_ref.dtype)


def focal_loss(inputs, targets, *, alpha=1.0, gamma=2.0, logits=False,
               reduce=True, binary_targets=False):
    """JAX/Pallas equivalent of FocalLoss(alpha, gamma, logits, reduce)(inputs, targets).

    Inputs may be f32 or bf16 (kernel computes in f32).  `binary_targets=True`
    is an optional fast path exact for hard {0,1} targets.
    """
    orig_shape = inputs.shape
    n = int(inputs.size)
    rows = pl.cdiv(n, _LANE)
    pad = rows * _LANE - n

    x = inputs.reshape(-1)
    t = targets.reshape(-1)
    if pad:
        # TODO(synk): the <=127-element tail pad still copies the flat arrays
        # when n % 128 != 0; a zero-copy path needs a layout-no-op 1-D -> 2-D
        # view inside the kernel.  Pad values are fully masked in-kernel.
        x = jnp.concatenate([x, jnp.ones((pad,), x.dtype)])
        t = jnp.concatenate([t, jnp.ones((pad,), t.dtype)])
    x2 = x.reshape(rows, _LANE)
    t2 = t.reshape(rows, _LANE)

    block_rows = min(_MAX_BLOCK_ROWS, rows)
    block_elems = block_rows * _LANE
    total_blocks = pl.cdiv(rows, block_rows)

    kw = dict(alpha=float(alpha), gamma=float(gamma),
              logits=bool(logits), binary_targets=bool(binary_targets))
    n_transcendentals = n if (binary_targets and not logits) else 3 * n
    in_bytes = 2 * rows * _LANE * inputs.dtype.itemsize
    cost = pl.CostEstimate(flops=12 * n, transcendentals=n_transcendentals,
                           bytes_accessed=in_bytes + (0 if reduce else
                                                      rows * _LANE * inputs.dtype.itemsize))

    if reduce:
        num_slices = 2 if total_blocks >= 2 else 1     # megacore split (v7x)
        bps = pl.cdiv(total_blocks, num_slices)

        def in_map(s, i):
            # clamp so a ragged split never indexes past the last block; the
            # duplicated block is fully masked in-kernel.
            return (jnp.minimum(s * bps + i, total_blocks - 1), 0)

        kernel = functools.partial(
            _focal_sum_kernel, **kw,
            full_rows=n // _LANE, lane_rem=n % _LANE,
            full_blocks=n // block_elems,
            block_rows=block_rows, blocks_per_slice=bps)

        partials = pl.pallas_call(
            kernel,
            out_shape=jax.ShapeDtypeStruct((num_slices, 1, _LANE), jnp.float32),
            grid_spec=pltpu.PrefetchScalarGridSpec(
                num_scalar_prefetch=0,
                grid=(num_slices, bps),
                in_specs=[
                    pl.BlockSpec((block_rows, _LANE), in_map),
                    pl.BlockSpec((block_rows, _LANE), in_map),
                ],
                out_specs=pl.BlockSpec((1, 1, _LANE), lambda s, i: (s, 0, 0)),
            ),
            compiler_params=pltpu.CompilerParams(
                dimension_semantics=("parallel", "arbitrary"),
                vmem_limit_bytes=_VMEM_LIMIT_BYTES),
            cost_estimate=cost,
        )(x2, t2)
        return jnp.sum(partials) * (1.0 / n)
    else:
        kernel = functools.partial(_focal_elem_kernel, **kw)
        out = pl.pallas_call(
            kernel,
            out_shape=jax.ShapeDtypeStruct((rows, _LANE), inputs.dtype),
            grid_spec=pltpu.PrefetchScalarGridSpec(
                num_scalar_prefetch=0,
                grid=(total_blocks,),
                in_specs=[
                    pl.BlockSpec((block_rows, _LANE), lambda i: (i, 0)),
                    pl.BlockSpec((block_rows, _LANE), lambda i: (i, 0)),
                ],
                out_specs=pl.BlockSpec((block_rows, _LANE), lambda i: (i, 0)),
            ),
            compiler_params=pltpu.CompilerParams(
                dimension_semantics=("parallel",),
                vmem_limit_bytes=_VMEM_LIMIT_BYTES),
            cost_estimate=cost,
        )(x2, t2)
        return out.reshape(-1)[:n].reshape(orig_shape)


def _focal_ref(inputs, targets, *, alpha=1.0, gamma=2.0, logits=False, reduce=True):
    """Pure-JAX reference for verification."""
    x = inputs.astype(jnp.float32)
    t = targets.astype(jnp.float32)
    if logits:
        bce = jnp.maximum(x, 0.0) - x * t + jnp.log1p(jnp.exp(-jnp.abs(x)))
    else:
        bce = -(t * jnp.maximum(jnp.log(x), -100.0)
                + (1.0 - t) * jnp.maximum(jnp.log(1.0 - x), -100.0))
    pt = jnp.exp(-bce)
    fl = alpha * (1.0 - pt) ** gamma * bce
    return jnp.mean(fl) if reduce else fl


if __name__ == "__main__":
    key = jax.random.PRNGKey(0)
    k_in, k_tg = jax.random.split(key)

    # Small NCHW probabilities in (0,1) and binary targets (FocalLoss defaults).
    shape = (2, 4, 16, 16)
    inputs = jax.nn.sigmoid(jax.random.normal(k_in, shape, dtype=jnp.float32))
    targets = (jax.random.uniform(k_tg, shape) > 0.5).astype(jnp.float32)

    # reduce=True (default path)
    out = jax.block_until_ready(focal_loss(inputs, targets))
    ref = _focal_ref(inputs, targets, reduce=True)
    assert jnp.allclose(out, ref, rtol=1e-5, atol=1e-6), (out, ref)

    # reduce=False (per-element map)
    out_map = jax.block_until_ready(focal_loss(inputs, targets, reduce=False))
    ref_map = _focal_ref(inputs, targets, reduce=False)
    assert jnp.allclose(out_map, ref_map, rtol=1e-5, atol=1e-6)

    # logits=True path
    logits_in = jax.random.normal(k_in, shape, dtype=jnp.float32)
    out_lg = jax.block_until_ready(focal_loss(logits_in, targets, logits=True))
    ref_lg = _focal_ref(logits_in, targets, logits=True, reduce=True)
    assert jnp.allclose(out_lg, ref_lg, rtol=1e-5, atol=1e-6), (out_lg, ref_lg)

    # Ragged shape: exercises the <=127-element tail pad, the masked boundary
    # block and the single-log binary-target fast path.
    shape2 = (2, 4, 131, 131)
    k_in2, k_tg2 = jax.random.split(jax.random.PRNGKey(0), 2)
    inputs2 = jax.nn.sigmoid(jax.random.normal(k_in2, shape2, dtype=jnp.float32))
    targets2 = (jax.random.uniform(k_tg2, shape2) > 0.5).astype(jnp.float32)
    ref2 = _focal_ref(inputs2, targets2, reduce=True)
    out2 = jax.block_until_ready(focal_loss(inputs2, targets2))
    assert jnp.allclose(out2, ref2, rtol=1e-5, atol=1e-6), (out2, ref2)
    out2b = jax.block_until_ready(focal_loss(inputs2, targets2, binary_targets=True))
    assert jnp.allclose(out2b, ref2, rtol=1e-5, atol=1e-6), (out2b, ref2)
    out2m = jax.block_until_ready(focal_loss(inputs2, targets2, reduce=False))
    ref2m = _focal_ref(inputs2, targets2, reduce=False)
    assert jnp.allclose(out2m, ref2m, rtol=1e-5, atol=1e-6)

    # Multi-block case (~1M elements): interior unmasked blocks + masked
    # partial boundary block + clamped duplicate block + megacore slice split.
    shape3 = (8, 8, 128, 130)
    k_in3, k_tg3 = jax.random.split(jax.random.PRNGKey(0), 2)
    inputs3 = jax.nn.sigmoid(jax.random.normal(k_in3, shape3, dtype=jnp.float32))
    targets3 = (jax.random.uniform(k_tg3, shape3) > 0.5).astype(jnp.float32)
    out3 = jax.block_until_ready(focal_loss(inputs3, targets3))
    ref3 = _focal_ref(inputs3, targets3, reduce=True)
    assert jnp.allclose(out3, ref3, rtol=1e-4, atol=1e-6), (out3, ref3)

    print("KERNEL_OK")
</pallas_src>

<mosaic_0001>
module attributes {stable_mosaic.version = 11 : i64} {
  func.func @_focal_sum_kernel(%arg0: i32, %arg1: i32, %arg2: memref<16x128xf32, #tpu.memory_space<vmem>>, %arg3: memref<16x128xf32, #tpu.memory_space<vmem>>, %arg4: memref<1x1x128xf32, #tpu.memory_space<vmem>>) attributes {dimension_semantics = [#tpu.dimension_semantics<parallel>, #tpu.dimension_semantics<arbitrary>], iteration_bounds = array<i64: 1, 1>, scalar_prefetch = 0 : i64, scratch_operands = 0 : i64, tpu.core_type = #tpu.core_type<tc>, window_params = [{transform_indices = @transform_0, window_bounds = array<i64: 16, 128>}, {transform_indices = @transform_1, window_bounds = array<i64: 16, 128>}, {transform_indices = @transform_2, window_bounds = array<i64: 1, 1, 128>}]} {
    %c0_i32 = arith.constant 0 : i32
    %0 = arith.cmpi eq, %arg1, %c0_i32 : i32
    %1 = arith.extui %0 : i1 to i32
    %c0_i32_0 = arith.constant 0 : i32
    %2 = arith.cmpi ne, %1, %c0_i32_0 : i32
    scf.if %2 {
      %cst_15 = arith.constant 0.000000e+00 : f32
      %37 = vector.broadcast %cst_15 : f32 to vector<1x1x128xf32>
      %c0_16 = arith.constant 0 : index
      %c0_17 = arith.constant 0 : index
      %c0_18 = arith.constant 0 : index
      %38 = vector.load %arg4[%c0_16, %c0_17, %c0_18] : memref<1x1x128xf32, #tpu.memory_space<vmem>>, vector<1x1x128xf32>
      tpu.vector_store %arg4[%c0_16, %c0_17, %c0_18], %37 {strides = array<i32>} : memref<1x1x128xf32, #tpu.memory_space<vmem>>, vector<1x1x128xf32>,
    } else {
    }
    %c0 = arith.constant 0 : index
    %c0_1 = arith.constant 0 : index
    %3 = vector.load %arg2[%c0, %c0_1] : memref<16x128xf32, #tpu.memory_space<vmem>>, vector<16x128xf32>
    %c0_2 = arith.constant 0 : index
    %c0_3 = arith.constant 0 : index
    %4 = vector.load %arg3[%c0_2, %c0_3] : memref<16x128xf32, #tpu.memory_space<vmem>>, vector<16x128xf32>
    %5 = math.log %3 : vector<16x128xf32>
    %cst = arith.constant -1.000000e+02 : f32
    %6 = vector.broadcast %cst : f32 to vector<16x128xf32>
    %7 = arith.maximumf %5, %6 : vector<16x128xf32>
    %cst_4 = arith.constant 1.000000e+00 : f32
    %8 = vector.broadcast %cst_4 : f32 to vector<16x128xf32>
    %9 = arith.subf %8, %3 : vector<16x128xf32>
    %10 = math.log %9 : vector<16x128xf32>
    %cst_5 = arith.constant -1.000000e+02 : f32
    %11 = vector.broadcast %cst_5 : f32 to vector<16x128xf32>
    %12 = arith.maximumf %10, %11 : vector<16x128xf32>
    %13 = arith.mulf %4, %7 : vector<16x128xf32>
    %cst_6 = arith.constant 1.000000e+00 : f32
    %14 = vector.broadcast %cst_6 : f32 to vector<16x128xf32>
    %15 = arith.subf %14, %4 : vector<16x128xf32>
    %16 = arith.mulf %15, %12 : vector<16x128xf32>
    %17 = arith.addf %13, %16 : vector<16x128xf32>
    %cst_7 = arith.constant 0.000000e+00 : f32
    %18 = vector.broadcast %cst_7 : f32 to vector<16x128xf32>
    %19 = arith.subf %18, %17 : vector<16x128xf32>
    %cst_8 = arith.constant 0.000000e+00 : f32
    %20 = vector.broadcast %cst_8 : f32 to vector<16x128xf32>
    %21 = arith.subf %20, %19 : vector<16x128xf32>
    %22 = math.exp %21 : vector<16x128xf32>
    %cst_9 = arith.constant 1.000000e+00 : f32
    %23 = vector.broadcast %cst_9 : f32 to vector<16x128xf32>
    %24 = arith.subf %23, %22 : vector<16x128xf32>
    %25 = arith.mulf %24, %24 : vector<16x128xf32>
    %cst_10 = arith.constant 1.000000e+00 : f32
    %26 = vector.broadcast %cst_10 : f32 to vector<16x128xf32>
    %27 = arith.mulf %26, %25 : vector<16x128xf32>
    %28 = arith.mulf %27, %19 : vector<16x128xf32>
    %c1_i32 = arith.constant 1 : i32
    %29 = arith.muli %arg0, %c1_i32 : i32
    %30 = arith.addi %29, %arg1 : i32
    %c1_i32_11 = arith.constant 1 : i32
    %31 = arith.cmpi slt, %30, %c1_i32_11 : i32
    %32 = arith.extui %31 : i1 to i32
    %c0_i32_12 = arith.constant 0 : i32
    %33 = arith.cmpi ne, %32, %c0_i32_12 : i32
    scf.if %33 {
      %c0_15 = arith.constant 0 : index
      %c0_16 = arith.constant 0 : index
      %c0_17 = arith.constant 0 : index
      %37 = vector.load %arg4[%c0_15, %c0_16, %c0_17] : memref<1x1x128xf32, #tpu.memory_space<vmem>>, vector<1x1x128xf32>
      %cst_18 = arith.constant dense<0.000000e+00> : vector<128xf32>
      %38 = vector.multi_reduction <add>, %28, %cst_18 [0] : vector<16x128xf32> to vector<128xf32>
      %39 = vector.shape_cast %38 : vector<128xf32> to vector<1x128xf32>
      %40 = vector.shape_cast %39 : vector<1x128xf32> to vector<1x1x128xf32>
      %41 = arith.addf %37, %40 : vector<1x1x128xf32>
      %c0_19 = arith.constant 0 : index
      %c0_20 = arith.constant 0 : index
      %c0_21 = arith.constant 0 : index
      %42 = vector.load %arg4[%c0_19, %c0_20, %c0_21] : memref<1x1x128xf32, #tpu.memory_space<vmem>>, vector<1x1x128xf32>
      tpu.vector_store %arg4[%c0_19, %c0_20, %c0_21], %41 {strides = array<i32>} : memref<1x1x128xf32, #tpu.memory_space<vmem>>, vector<1x1x128xf32>,
    } else {
    }
    %c1_i32_13 = arith.constant 1 : i32
    %34 = arith.cmpi sge, %30, %c1_i32_13 : i32
    %35 = arith.extui %34 : i1 to i32
    %c0_i32_14 = arith.constant 0 : i32
    %36 = arith.cmpi ne, %35, %c0_i32_14 : i32
    scf.if %36 {
      %37 = tpu.iota {dimensions = array<i32: 0>} : vector<16x128xi32>
      %38 = tpu.iota {dimensions = array<i32: 1>} : vector<16x128xi32>
      %c16_i32 = arith.constant 16 : i32
      %39 = arith.muli %30, %c16_i32 : i32
      %40 = vector.broadcast %39 : i32 to vector<16x128xi32>
      %41 = arith.addi %40, %37 : vector<16x128xi32>
      %c16_i32_15 = arith.constant 16 : i32
      %42 = vector.broadcast %c16_i32_15 : i32 to vector<16x128xi32>
      %43 = arith.cmpi slt, %41, %42 : vector<16x128xi32>
      %c16_i32_16 = arith.constant 16 : i32
      %44 = vector.broadcast %c16_i32_16 : i32 to vector<16x128xi32>
      %45 = arith.cmpi eq, %41, %44 : vector<16x128xi32>
      %c0_i32_17 = arith.constant 0 : i32
      %46 = vector.broadcast %c0_i32_17 : i32 to vector<16x128xi32>
      %47 = arith.cmpi slt, %38, %46 : vector<16x128xi32>
      %48 = arith.andi %45, %47 : vector<16x128xi1>
      %49 = arith.ori %43, %48 : vector<16x128xi1>
      %cst_18 = arith.constant 0.000000e+00 : f32
      %50 = vector.broadcast %cst_18 : f32 to vector<16x128xf32>
      %51 = arith.select %49, %28, %50 : vector<16x128xi1>, vector<16x128xf32>
      %c0_19 = arith.constant 0 : index
      %c0_20 = arith.constant 0 : index
      %c0_21 = arith.constant 0 : index
      %52 = vector.load %arg4[%c0_19, %c0_20, %c0_21] : memref<1x1x128xf32, #tpu.memory_space<vmem>>, vector<1x1x128xf32>
      %cst_22 = arith.constant dense<0.000000e+00> : vector<128xf32>
      %53 = vector.multi_reduction <add>, %51, %cst_22 [0] : vector<16x128xf32> to vector<128xf32>
      %54 = vector.shape_cast %53 : vector<128xf32> to vector<1x128xf32>
      %55 = vector.shape_cast %54 : vector<1x128xf32> to vector<1x1x128xf32>
      %56 = arith.addf %52, %55 : vector<1x1x128xf32>
      %c0_23 = arith.constant 0 : index
      %c0_24 = arith.constant 0 : index
      %c0_25 = arith.constant 0 : index
      %57 = vector.load %arg4[%c0_23, %c0_24, %c0_25] : memref<1x1x128xf32, #tpu.memory_space<vmem>>, vector<1x1x128xf32>
      tpu.vector_store %arg4[%c0_23, %c0_24, %c0_25], %56 {strides = array<i32>} : memref<1x1x128xf32, #tpu.memory_space<vmem>>, vector<1x1x128xf32>,
    } else {
    }
    return
  }
  func.func @transform_0(%arg0: i32, %arg1: i32) -> (i32, i32) {
    %c1_i32 = arith.constant 1 : i32
    %0 = arith.muli %arg0, %c1_i32 : i32
    %1 = arith.addi %0, %arg1 : i32
    %c0_i32 = arith.constant 0 : i32
    %2 = arith.minsi %1, %c0_i32 : i32
    %c0_i32_0 = arith.constant 0 : i32
    %c0_i32_1 = arith.constant 0 : i32
    return %2, %c0_i32_0 : i32, i32
  }
  func.func @transform_1(%arg0: i32, %arg1: i32) -> (i32, i32) {
    %c1_i32 = arith.constant 1 : i32
    %0 = arith.muli %arg0, %c1_i32 : i32
    %1 = arith.addi %0, %arg1 : i32
    %c0_i32 = arith.constant 0 : i32
    %2 = arith.minsi %1, %c0_i32 : i32
    %c0_i32_0 = arith.constant 0 : i32
    %c0_i32_1 = arith.constant 0 : i32
    return %2, %c0_i32_0 : i32, i32
  }
  func.func @transform_2(%arg0: i32, %arg1: i32) -> (i32, i32, i32) {
    %c0_i32 = arith.constant 0 : i32
    %c0_i32_0 = arith.constant 0 : i32
    %c0_i32_1 = arith.constant 0 : i32
    return %arg0, %c0_i32, %c0_i32_0 : i32, i32, i32
  }
}

</mosaic_0001>

<bundles_post_ra>
// kernel: tpu_custom_call.1
= control target key start
LH: loop header
LB: loop body
LE: loop exit
PB: predicated region body
PF: predicated region fallthrough
CT: control target
= control target key end

     0   :  { %7 = vsyncpa [#allocation3], 0  ;;  %s321_s0 = inlined_call_operand.hbm [shape: f32[16,128], index: 0, kind: input, shape index: {}]   ;;  %s322_s1 = inlined_call_operand.hbm [shape: f32[16,128], index: 1, kind: input, shape index: {}]   ;;  %s323_s2 = inlined_call_operand.hbm [shape: f32[1,1,128], index: 2, kind: output, shape index: {}]  }
   0x1   :  { %8 = vsyncpa [#allocation6], 0 }
   0x2   :  { %9 = vsyncpa [#allocation4], 0  ;;  %s264_s9 = smov [#allocation2]   ;;  %s192_s13 = scalar_lea.hbm %s321_s0, 256 }
   0x3   :  { %s21_s10 = sshll.u32 %s264_s9, 4  ;;  %p193_p0 = scmp.ne.s32.totalorder %s321_s0, %s192_s13  ;;  %s22_s10 = int_to_ptr.vmem [resolvable:$true] %s21_s10 }
   0x4   :  { %p196_p1 = scmp.lt.u32.totalorder %s192_s13, %s321_s0 }
   0x6   :  { %p198_p2 = pnand %p196_p1, %p193_p0 }
   0x8   :  { %201 = shalt.err (!%p198_p2)
}
   0x9   :  { %s202_s18 = scalar_lea.vmem %s22_s10, 256  ;;  %p207_p4 = scmp.lt.s32.totalorder %s22_s10, %s22_s10 }
   0xa   :  { %p203_p3 = scmp.ne.s32.totalorder %s22_s10, %s202_s18  ;;  %p208_p5 = scmp.lt.s32.totalorder %s202_s18, %s202_s18 }
   0xc   :  { %p209_p6 = por %p208_p5, %p207_p4 }
   0xe   :  { %p210_p7 = pnand %p209_p6, %p203_p3 }
  0x10   :  { %213 = shalt.err (!%p210_p7)
}
  0x11   :  { %s265_s19 = smov 128   ;;  %s266_s20 = smov 8  }
  0x12   :  { %27 = dma.hbm_to_vmem [thread:$0]  %s321_s0, 256, %s22_s10, [#allocation3], %s265_s19, %s265_s19, %s266_s20  }
  0x13   :  { %s267_s23 = smov [#allocation5]   ;;  %s214_s27 = scalar_lea.hbm %s322_s1, 256 }
  0x14   :  { %s39_s24 = sshll.u32 %s267_s23, 4  ;;  %p215_p8 = scmp.ne.s32.totalorder %s322_s1, %s214_s27  ;;  %s40_s24 = int_to_ptr.vmem [resolvable:$true] %s39_s24 }
  0x15   :  { %p218_p9 = scmp.lt.u32.totalorder %s214_s27, %s322_s1 }
  0x17   :  { %p220_p10 = pnand %p218_p9, %p215_p8 }
  0x19   :  { %223 = shalt.err (!%p220_p10)
}
  0x1a   :  { %s224_s4 = scalar_lea.vmem %s40_s24, 256  ;;  %p229_p12 = scmp.lt.s32.totalorder %s40_s24, %s40_s24 }
  0x1b   :  { %p225_p11 = scmp.ne.s32.totalorder %s40_s24, %s224_s4  ;;  %p230_p13 = scmp.lt.s32.totalorder %s224_s4, %s224_s4 }
  0x1d   :  { %p231_p0 = por %p230_p13, %p229_p12 }
  0x1f   :  { %p232_p1 = pnand %p231_p0, %p225_p11 }
  0x21   :  { %235 = shalt.err (!%p232_p1)
}
  0x22   :  { %45 = dma.hbm_to_vmem [thread:$0]  %s322_s1, 256, %s40_s24, [#allocation6], %s265_s19, %s265_s19, %s266_s20  }
  0x23   :  { %258 = dma.done.wait [#allocation3], 256  }
  0x24   :  { %259 = vsyncadd [#allocation3], 4294967040 }
  0x25   :  { %260 = dma.done.wait [#allocation6], 256  }
  0x26   :  { %261 = vsyncadd [#allocation6], 4294967040  ;;  %v268_v0 = vmov 0.0   ;;  %v65_v1 = vld [vmem:[#allocation2] sm:$0xff]  ;;  %v66_v2 = vld [vmem:[#allocation2 + $0x8] sm:$0xff]  ;;  %s269_s1 = smov [#allocation7]  }
  0x27   :  { %64 = vst [vmem:[#allocation7] sm:$0x1] %v268_v0  ;;  %180 = vlog2.f32 %v65_v1  ;;  %v75_v3 = vsub.f32 1.0, %v65_v1  ;;  %v76_v4 = vsub.f32 1.0, %v66_v2  ;;  %v67_v6 = vld [vmem:[#allocation5] sm:$0xff]  ;;  %v68_v8 = vld [vmem:[#allocation5 + $0x8] sm:$0xff] }
  0x28   :  { %182 = vlog2.f32 %v66_v2  ;;  %v85_v15 = vsub.f32 1.0, %v67_v6  ;;  %v86_v18 = vsub.f32 1.0, %v68_v8  ;;  %s160_s6 = sshll.u32 %s269_s1, 4  ;;  %s161_s6 = int_to_ptr.vmem [resolvable:$true] %s160_s6 }
  0x29   :  { %184 = vlog2.f32 %v75_v3  ;;  %s236_s7 = scalar_lea.vmem %s161_s6, 16  ;;  %s240_s8 = scalar_lea.vmem %s161_s6, 32 }
  0x2a   :  { %186 = vlog2.f32 %v76_v4  ;;  %p237_p2 = scmp.ne.s32.totalorder %s161_s6, %s236_s7  ;;  %p241_p3 = scmp.lt.s32.totalorder %s161_s6, %s161_s6 }
  0x2b   :  { %p242_p4 = scmp.lt.s32.totalorder %s240_s8, %s236_s7 }
  0x2d   :  { %p243_p5 = por %p242_p4, %p241_p3 }
  0x2e   :  { %v110_v47 = vld [vmem:[#allocation7] sm:$0x1] }
  0x2f   :  { %p244_p6 = pnand %p243_p5, %p237_p2 }
  0x31   :  { %v181_v5 = vpop.eup %180 }
  0x32   :  { %v183_v7 = vpop.eup %182  ;;  %v70_v9 = vmul.f32 0.6931472, %v181_v5 }
  0x33   :  { %v185_v10 = vpop.eup %184  ;;  %v72_v11 = vmul.f32 0.6931472, %v183_v7 }
  0x34   :  { %v187_v12 = vpop.eup %186  ;;  %v73_v13 = vmax.f32 %v70_v9, -100.0  ;;  %v78_v14 = vmul.f32 0.6931472, %v185_v10 }
  0x35   :  { %v74_v16 = vmax.f32 %v72_v11, -100.0  ;;  %v80_v17 = vmul.f32 0.6931472, %v187_v12 }
  0x36   :  { %v81_v19 = vmax.f32 %v78_v14, -100.0  ;;  %v83_v20 = vmul.f32 %v73_v13, %v67_v6 }
  0x37   :  { %v82_v21 = vmax.f32 %v80_v17, -100.0  ;;  %v84_v22 = vmul.f32 %v74_v16, %v68_v8 }
  0x38   :  { %v87_v23 = vmul.f32 %v85_v15, %v81_v19 }
  0x39   :  { %v88_v24 = vmul.f32 %v86_v18, %v82_v21 }
  0x3a   :  { %v89_v25 = vadd.f32 %v87_v23, %v83_v20 }
  0x3b   :  { %v90_v26 = vadd.f32 %v88_v24, %v84_v22 }
  0x3c   :  { %v91_v27 = vsub.f32 0.0, %v89_v25 }
  0x3d   :  { %v92_v28 = vsub.f32 0.0, %v90_v26 }
  0x3e   :  { %v93_v29 = vsub.f32 0.0, %v91_v27 }
  0x3f   :  { %v94_v30 = vsub.f32 0.0, %v92_v28 }
  0x40   :  { %v95_v31 = vmul.f32 1.442695, %v93_v29 }
  0x41   :  { %v97_v32 = vmul.f32 1.442695, %v94_v30 }
  0x42   :  { %188 = vpow2.f32 %v95_v31 }
  0x43   :  { %190 = vpow2.f32 %v97_v32 }
  0x4c   :  { %v189_v33 = vpop.eup %188 }
  0x4d   :  { %v191_v34 = vpop.eup %190  ;;  %v99_v35 = vsub.f32 1.0, %v189_v33 }
  0x4e   :  { %v100_v36 = vsub.f32 1.0, %v191_v34 }
  0x4f   :  { %v101_v37 = vmul.f32 %v99_v35, %v99_v35 }
  0x50   :  { %v102_v38 = vmul.f32 %v100_v36, %v100_v36 }
  0x51   :  { %v103_v39 = vmul.f32 %v101_v37, %v91_v27 }
  0x52   :  { %v104_v40 = vmul.f32 %v102_v38, %v92_v28 }
  0x54   :  { %v111_v41 = vadd.f32 %v104_v40, %v103_v39 }
  0x56   :  { %v112_v42 = vrot.slane %v111_v41, 4 }
  0x58   :  { %v113_v43 = vadd.f32 %v112_v42, %v111_v41 }
  0x5a   :  { %v114_v44 = vrot.slane %v113_v43, 2 }
  0x5c   :  { %v115_v45 = vadd.f32 %v114_v44, %v113_v43 }
  0x5e   :  { %v116_v46 = vrot.slane %v115_v45, 1 }
  0x60   :  { %v117_v48 = vadd.f32 %v116_v46, %v115_v45 }
  0x62   :  { %v118_v49 = vadd.f32 %v117_v48, %v110_v47 }
  0x64   :  { %119 = vst [vmem:[#allocation7] sm:$0x1] %v118_v49 }
  0x65   :  { %247 = shalt.err (!%p244_p6)
}
  0x66   :  { %s248_s11 = scalar_lea.hbm %s323_s2, 16 }
  0x67   :  { %p249_p7 = scmp.ne.s32.totalorder %s323_s2, %s248_s11  ;;  %p252_p8 = scmp.lt.u32.totalorder %s248_s11, %s323_s2 }
  0x69   :  { %p254_p9 = pnand %p252_p8, %p249_p7 }
  0x6b   :  { %257 = shalt.err (!%p254_p9)
}
  0x6c   :  { %163 = dma.vmem_to_hbm [thread:$0]  %s161_s6, 16, %s323_s2, [#allocation4]  }
  0x6d   :  { %262 = dma.done.wait [#allocation4], 16  }
  0x6e   :  { %263 = vsyncadd [#allocation4], 4294967280 }
  0x6f   :  { %167 = vsyncpa [#allocation3], 1 }
  0x70   :  { %168 = vsyncpa [#allocation6], 1 }
  0x71   :  { %169 = vsyncpa [#allocation4], 1 }

</bundles_post_ra>
